<compile_context>
chip_gen: v6e
topology: v6e:2x2x1
jax: 0.10.0
libtpu: 0.0.40
codegen_flags: <defaults>
</compile_context>

<pallas_src>
import functools
import math

import jax
import jax.numpy as jnp
from jax.experimental import pallas as pl
from jax.experimental.pallas import tpu as pltpu

D_MODEL = 64
DROPOUT_P = 0.1
MAX_LEN = 128  # small synthetic max_len (module default is 5000; table is glue)


def build_pe_table(max_len: int, d_model: int) -> jnp.ndarray:
    """Plain-JAX construction of the sin/cos positional table (glue, not hot path)."""
    position = jnp.arange(max_len, dtype=jnp.float32)[:, None]              # (L, 1)
    div_term = jnp.exp(
        jnp.arange(0, d_model, 2, dtype=jnp.float32) * (-math.log(10000.0) / d_model)
    )                                                                        # (D/2,)
    angles = position * div_term                                             # (L, D/2)
    pe = jnp.zeros((max_len, d_model), dtype=jnp.float32)
    pe = pe.at[:, 0::2].set(jnp.sin(angles))
    pe = pe.at[:, 1::2].set(jnp.cos(angles))
    return pe                                                                # (L, D)


def _pe_kernel(x_ref, pe_ref, o_ref, *, block_s: int):
    # x_ref/o_ref: (block_s, B*D) tile; pe_ref: resident (S_pad, B*D) table.
    start = pl.multiple_of(pl.program_id(0) * block_s, block_s)
    o_ref[...] = x_ref[...] + pe_ref[pl.ds(start, block_s), :]


def _pe_dropout_kernel(x_ref, pe_ref, u_ref, o_ref, *, block_s: int, p: float):
    start = pl.multiple_of(pl.program_id(0) * block_s, block_s)
    y = x_ref[...] + pe_ref[pl.ds(start, block_s), :]
    keep = u_ref[...] >= p                      # inverted dropout
    scale = 1.0 / (1.0 - p)
    o_ref[...] = jnp.where(keep, y * scale, 0.0).astype(o_ref.dtype)


def positional_encoding(x, pe_table, *, p=DROPOUT_P, training=False, rng=None):
    """x: (S, B, D) float32.  Returns dropout(x + pe[:S]) with PyTorch semantics."""
    S, B, D = x.shape
    assert S <= pe_table.shape[0], "sequence length exceeds positional table max_len"
    BD = B * D
    itemsize = jnp.dtype(x.dtype).itemsize

    # Lane-dense flattening: (S, B, D) -> (S, B*D). Positional table is tiled
    # once across the batch so the kernel is a plain 2-D elementwise add.
    xf = x.reshape(S, BD)
    pe_tiled = jnp.tile(pe_table[:S], (1, B)).astype(x.dtype)   # (S, B*D)

    # Tile sizing: target ~2 MiB per input tile; use the whole array when it fits.
    bytes_per_row = BD * itemsize
    target_rows = max(8, (2 << 20) // max(bytes_per_row, 1))
    if S <= target_rows:
        block_s = S
    else:
        block_s = max(8, (target_rows // 8) * 8)   # sublane-aligned partial tiles
    grid_n = pl.cdiv(S, block_s)

    # Pad the resident pe table so dynamic slices on the last (partial) tile
    # never read out of bounds.
    s_pad = grid_n * block_s
    pe_res = pe_tiled if s_pad == S else jnp.pad(pe_tiled, ((0, s_pad - S), (0, 0)))

    # Explicit VMEM budget: double-buffered in/out (+ random stream in training)
    # plus the resident table, with headroom. Portable across v5e/v6e/v7x.
    tile_bytes = block_s * BD * itemsize
    n_streams = 4 + (2 if (training and p > 0.0) else 0)
    need = n_streams * tile_bytes + s_pad * BD * itemsize + (1 << 20)
    vmem_limit = int(min(max(need, 16 << 20), 48 << 20))

    compiler_params = pltpu.CompilerParams(
        dimension_semantics=("parallel",),      # independent tiles -> megacore-friendly
        vmem_limit_bytes=vmem_limit,
    )

    x_spec = pl.BlockSpec((block_s, BD), lambda i: (i, 0))
    pe_spec = pl.BlockSpec((s_pad, BD), lambda i: (0, 0))       # resident, DMA'd once
    out_spec = pl.BlockSpec((block_s, BD), lambda i: (i, 0))
    out_shape = jax.ShapeDtypeStruct((S, BD), x.dtype)

    if training and p > 0.0:
        # TODO(synk): random mask comes from jax.random (host-side key), so it
        # cannot bit-match PyTorch's dropout RNG stream.
        if rng is None:
            rng = jax.random.PRNGKey(0)
        u = jax.random.uniform(rng, (S, BD), dtype=jnp.float32)
        u_spec = pl.BlockSpec((block_s, BD), lambda i: (i, 0))
        kernel = functools.partial(_pe_dropout_kernel, block_s=block_s, p=float(p))
        yf = pl.pallas_call(
            kernel,
            out_shape=out_shape,
            grid=(grid_n,),
            in_specs=[x_spec, pe_spec, u_spec],
            out_specs=out_spec,
            compiler_params=compiler_params,
        )(xf, pe_res, u)
    else:
        kernel = functools.partial(_pe_kernel, block_s=block_s)
        yf = pl.pallas_call(
            kernel,
            out_shape=out_shape,
            grid=(grid_n,),
            in_specs=[x_spec, pe_spec],
            out_specs=out_spec,
            compiler_params=compiler_params,
        )(xf, pe_res)

    return yf.reshape(S, B, D)


if __name__ == "__main__":
    key = jax.random.PRNGKey(0)
    S, B, D = 8, 2, D_MODEL  # seq=8, batch=2, d_model=64
    x = jax.random.normal(key, (S, B, D), dtype=jnp.float32)

    pe_table = build_pe_table(MAX_LEN, D)

    # Eval mode (dropout is identity) -- deterministic, checked against reference.
    out = positional_encoding(x, pe_table, p=DROPOUT_P, training=False)
    out = jax.block_until_ready(out)

    ref = x + pe_table[:S][:, None, :]
    assert out.shape == (S, B, D)
    assert jnp.allclose(out, ref, atol=1e-6, rtol=1e-6), "mismatch vs reference"

    # Training mode (dropout) -- check inverted-dropout semantics: every output
    # element is either 0 (dropped) or (x+pe)/(1-p) (kept & rescaled).
    out_train = positional_encoding(
        x, pe_table, p=DROPOUT_P, training=True, rng=jax.random.PRNGKey(123)
    )
    out_train = jax.block_until_ready(out_train)
    assert out_train.shape == (S, B, D)
    scaled = ref / (1.0 - DROPOUT_P)
    ok = jnp.isclose(out_train, scaled, atol=1e-5) | (out_train == 0.0)
    assert bool(jnp.all(ok)), "dropout output is neither kept-scaled nor zero"

    print("KERNEL_OK")
</pallas_src>

<mosaic_0001>
module attributes {stable_mosaic.version = 11 : i64} {
  func.func @_pe_kernel(%arg0: i32, %arg1: memref<8x128xf32, #tpu.memory_space<vmem>>, %arg2: memref<8x128xf32, #tpu.memory_space<vmem>>, %arg3: memref<8x128xf32, #tpu.memory_space<vmem>>) attributes {dimension_semantics = [#tpu.dimension_semantics<parallel>], iteration_bounds = array<i64: 1>, scalar_prefetch = 0 : i64, scratch_operands = 0 : i64, tpu.core_type = #tpu.core_type<tc>, window_params = [{transform_indices = @transform_0, window_bounds = array<i64: 8, 128>}, {pipeline_mode = #tpu.pipeline_mode<synchronous>, transform_indices = @transform_1, window_bounds = array<i64: 8, 128>}, {transform_indices = @transform_2, window_bounds = array<i64: 8, 128>}]} {
    %c8_i32 = arith.constant 8 : i32
    %0 = arith.muli %arg0, %c8_i32 : i32
    %1 = tpu.assume_multiple %0, 8 : i32
    %c0 = arith.constant 0 : index
    %c0_0 = arith.constant 0 : index
    %2 = vector.load %arg1[%c0, %c0_0] : memref<8x128xf32, #tpu.memory_space<vmem>>, vector<8x128xf32>
    %3 = arith.index_cast %1 : i32 to index
    %c0_1 = arith.constant 0 : index
    %4 = vector.load %arg2[%3, %c0_1] : memref<8x128xf32, #tpu.memory_space<vmem>>, vector<8x128xf32>
    %5 = arith.addf %2, %4 : vector<8x128xf32>
    %c0_2 = arith.constant 0 : index
    %c0_3 = arith.constant 0 : index
    %6 = vector.load %arg3[%c0_2, %c0_3] : memref<8x128xf32, #tpu.memory_space<vmem>>, vector<8x128xf32>
    tpu.vector_store %arg3[%c0_2, %c0_3], %5 {strides = array<i32>} : memref<8x128xf32, #tpu.memory_space<vmem>>, vector<8x128xf32>,
    return
  }
  func.func @transform_0(%arg0: i32) -> (i32, i32) {
    %c0_i32 = arith.constant 0 : i32
    %c0_i32_0 = arith.constant 0 : i32
    return %arg0, %c0_i32 : i32, i32
  }
  func.func @transform_1(%arg0: i32) -> (i32, i32) {
    %c0_i32 = arith.constant 0 : i32
    %c0_i32_0 = arith.constant 0 : i32
    %c0_i32_1 = arith.constant 0 : i32
    return %c0_i32, %c0_i32_0 : i32, i32
  }
  func.func @transform_2(%arg0: i32) -> (i32, i32) {
    %c0_i32 = arith.constant 0 : i32
    %c0_i32_0 = arith.constant 0 : i32
    return %arg0, %c0_i32 : i32, i32
  }
}

</mosaic_0001>

<bundles_post_ra>
// kernel: tpu_custom_call.1
= control target key start
LH: loop header
LB: loop body
LE: loop exit
PB: predicated region body
PF: predicated region fallthrough
CT: control target
= control target key end

     0   :  { %7 = vsyncpa [#allocation3], 0  ;;  %s154_s0 = inlined_call_operand.hbm [shape: f32[8,128], index: 0, kind: input, shape index: {}]   ;;  %s155_s1 = inlined_call_operand.hbm [shape: f32[8,128], index: 1, kind: input, shape index: {}]   ;;  %s156_s2 = inlined_call_operand.hbm [shape: f32[8,128], index: 2, kind: output, shape index: {}]  }
   0x1   :  { %8 = vsyncpa [#allocation6], 0 }
   0x2   :  { %9 = vsyncpa [#allocation4], 0  ;;  %s127_s9 = smov [#allocation2]   ;;  %s128_s11 = smov [#allocation5]  }
   0x3   :  { %s16_s10 = sshll.u32 %s127_s9, 4  ;;  %s26_s12 = sshll.u32 %s128_s11, 4  ;;  %s17_s10 = int_to_ptr.vmem [resolvable:$true] %s16_s10  ;;  %s27_s12 = int_to_ptr.vmem [resolvable:$true] %s26_s12 }
   0x4   :  { %s69_s13 = scalar_lea.vmem %s17_s10, 128  ;;  %p74_p1 = scmp.lt.s32.totalorder %s17_s10, %s17_s10 }
   0x5   :  { %p70_p0 = scmp.ne.s32.totalorder %s17_s10, %s69_s13  ;;  %p75_p2 = scmp.lt.s32.totalorder %s69_s13, %s69_s13 }
   0x7   :  { %p76_p3 = por %p75_p2, %p74_p1 }
   0x9   :  { %p77_p4 = pnand %p76_p3, %p70_p0 }
   0xb   :  { %80 = shalt.err (!%p77_p4)
}
   0xc   :  { %19 = dma.hbm_to_vmem [thread:$0]  %s154_s0, 128, %s17_s10, [#allocation3]  }
   0xd   :  { %s89_s16 = scalar_lea.vmem %s27_s12, 128  ;;  %p94_p6 = scmp.lt.s32.totalorder %s27_s12, %s27_s12 }
   0xe   :  { %p90_p5 = scmp.ne.s32.totalorder %s27_s12, %s89_s16  ;;  %p95_p7 = scmp.lt.s32.totalorder %s89_s16, %s89_s16 }
  0x10   :  { %p96_p8 = por %p95_p7, %p94_p6 }
  0x12   :  { %p97_p9 = pnand %p96_p8, %p90_p5 }
  0x14   :  { %100 = shalt.err (!%p97_p9)
}
  0x15   :  { %29 = dma.hbm_to_vmem [thread:$0]  %s155_s1, 128, %s27_s12, [#allocation6]  }
  0x16   :  { %121 = dma.done.wait [#allocation3], 128  }
  0x17   :  { %122 = vsyncadd [#allocation3], 4294967168 }
  0x18   :  { %123 = dma.done.wait [#allocation6], 128  }
  0x19   :  { %124 = vsyncadd [#allocation6], 4294967168  ;;  %s129_s19 = smov [#allocation7]   ;;  %v37_v0 = vld [vmem:[#allocation2] sm:$0xff]  ;;  %v39_v1 = vld [vmem:[#allocation5] sm:$0xff] }
  0x1a   :  { %s48_s20 = sshll.u32 %s129_s19, 4  ;;  %v40_v2 = vadd.f32 %v39_v1, %v37_v0  ;;  %s49_s20 = int_to_ptr.vmem [resolvable:$true] %s48_s20 }
  0x1b   :  { %s101_s0 = scalar_lea.vmem %s49_s20, 128  ;;  %p106_p11 = scmp.lt.s32.totalorder %s49_s20, %s49_s20 }
  0x1c   :  { %41 = vst [vmem:[#allocation7] sm:$0xff] %v40_v2  ;;  %p102_p10 = scmp.ne.s32.totalorder %s49_s20, %s101_s0  ;;  %p107_p12 = scmp.lt.s32.totalorder %s101_s0, %s101_s0 }
  0x1e   :  { %p108_p13 = por %p107_p12, %p106_p11 }
  0x20   :  { %p109_p0 = pnand %p108_p13, %p102_p10 }
  0x22   :  { %112 = shalt.err (!%p109_p0)
}
  0x23   :  { %51 = dma.vmem_to_hbm [thread:$0]  %s49_s20, 128, %s156_s2, [#allocation4]  }
  0x24   :  { %125 = dma.done.wait [#allocation4], 128  }
  0x25   :  { %126 = vsyncadd [#allocation4], 4294967168 }
  0x26   :  { %55 = vsyncpa [#allocation3], 1 }
  0x27   :  { %56 = vsyncpa [#allocation6], 1 }
  0x28   :  { %57 = vsyncpa [#allocation4], 1 }

</bundles_post_ra>
